<compile_context>
chip_gen: v7x
topology: tpu7x:2x2x1
jax: 0.10.0
libtpu: 0.0.40
codegen_flags: <defaults>
</compile_context>

<pallas_src>
import math
import jax
import jax.numpy as jnp
from jax.experimental import pallas as pl
from jax.experimental.pallas import tpu as pltpu


def _round_up(x, m):
    return ((x + m - 1) // m) * m


# ----------------------------- Pallas kernel ------------------------------- #
def _decoder_kernel(rep_ref, tx_ref,
                    w0r_ref, wtx_ref, b0_ref,
                    w1_ref, b1_ref,
                    w2_ref, b2_ref,
                    wf_ref, bf_ref,
                    out_ref):
    # Layer 0 with target_projection folded in (see prepare_decoder_params):
    #   h = relu(rep @ W0_rep + tx @ (Wp @ W0_tx) + (bp @ W0_tx + b0))
    # target_x and the folded 1024xD weight live in HBM as f32 (no extra host cast
    # pass); cast to bf16 here, right before the K=1024 dot, with f32 accumulation.
    tx_bf = tx_ref[...].astype(jnp.bfloat16)
    wtx_bf = wtx_ref[...].astype(jnp.bfloat16)
    h = jnp.dot(tx_bf, wtx_bf, preferred_element_type=jnp.float32)
    h = h + jnp.dot(rep_ref[...], w0r_ref[...], preferred_element_type=jnp.float32)
    h = jnp.maximum(h + b0_ref[...], 0.0)

    # layers 1, 2 (small DxD, kept f32; kernel is HBM-bound so MXU slack is huge)
    h = jnp.maximum(
        jnp.dot(h, w1_ref[...], preferred_element_type=jnp.float32) + b1_ref[...], 0.0)
    h = jnp.maximum(
        jnp.dot(h, w2_ref[...], preferred_element_type=jnp.float32) + b2_ref[...], 0.0)

    # final_projection: Linear(D -> 2); col 0 = mu, col 1 = log_sigma
    o = jnp.dot(h, wf_ref[...], preferred_element_type=jnp.float32) + bf_ref[...]
    mu = o[:, 0:1]
    sigma = 0.1 + 0.9 * jnp.logaddexp(o[:, 1:2], 0.0)     # stable softplus
    out_ref[...] = jnp.concatenate([mu, sigma], axis=1)   # single (tm, 2) store


# ------------------------------- wrapper ------------------------------------ #
class IndependentNormalDiag:
    """Tiny stand-in for torch.distributions.Independent(Normal(loc, scale), 1)."""
    # TODO(synk): full torch.distributions semantics (sampling RNG plumbing etc.)
    # have no Pallas equivalent; only mean/stddev/log_prob are provided (plain JAX).
    def __init__(self, loc, scale_diag):
        self.loc = loc
        self.scale_diag = scale_diag

    def log_prob(self, x):
        z = (x - self.loc) / self.scale_diag
        lp = -0.5 * z * z - jnp.log(self.scale_diag) - 0.5 * math.log(2.0 * math.pi)
        return jnp.sum(lp, axis=-1)   # Independent(..., 1): sum over last event dim


def _xavier_uniform(key, shape, gain):
    fan_in, fan_out = shape
    bound = gain * math.sqrt(6.0 / (fan_in + fan_out))
    return jax.random.uniform(key, shape, jnp.float32, -bound, bound)


def _linear_bias(key, fan_in, out_dim):
    bound = 1.0 / math.sqrt(fan_in)
    return jax.random.uniform(key, (1, out_dim), jnp.float32, -bound, bound)


def init_decoder_params(key, num_hidden, use_latent_path):
    """Deterministic synthetic init mirroring the torch module's shapes/schemes.

    Weights are stored in (in_dim, out_dim) layout (x @ W + b), the transpose of
    torch's nn.Linear storage but identical math."""
    gain_lin = 1.0
    gain_relu = math.sqrt(2.0)
    D = num_hidden * (3 if use_latent_path else 2)
    Hrep = D - num_hidden

    ks = jax.random.split(key, 10)
    params = {
        "wp": _xavier_uniform(ks[0], (1024, num_hidden), gain_lin),
        "bp": _linear_bias(ks[1], 1024, num_hidden),
        "w0": _xavier_uniform(ks[2], (D, D), gain_relu),
        "b0": _linear_bias(ks[3], D, D),
        "w1": _xavier_uniform(ks[4], (D, D), gain_relu),
        "b1": _linear_bias(ks[5], D, D),
        "w2": _xavier_uniform(ks[6], (D, D), gain_relu),
        "b2": _linear_bias(ks[7], D, D),
        "wf": _xavier_uniform(ks[8], (D, 2), gain_lin),
        "bf": _linear_bias(ks[9], D, 2),
    }
    params["Hrep"] = Hrep
    params["D"] = D
    return params


def prepare_decoder_params(params):
    """One-time fold of target_projection into layer 0 (hoisted out of the forward):
        cat(rep, tx@Wp + bp) @ W0 + b0
          == rep @ W0[:Hrep] + tx @ (Wp @ W0[Hrep:]) + (bp @ W0[Hrep:] + b0)
    All folded tensors kept in f32 (weight-resident -> negligible HBM cost)."""
    Hrep = params["Hrep"]
    w0_tx = params["w0"][Hrep:, :]
    prepared = dict(params)
    prepared["w0_rep"] = params["w0"][:Hrep, :]                     # (Hrep, D) f32
    prepared["wtx_fold"] = params["wp"] @ w0_tx                     # (1024, D) f32
    prepared["b0_fold"] = params["bp"] @ w0_tx + params["b0"]       # (1, D)    f32
    return jax.tree_util.tree_map(
        lambda x: jax.device_put(x) if isinstance(x, jnp.ndarray) else x, prepared)


def _choose_row_tile(M, max_row_tile, min_grid_steps):
    """Row tile: big enough to amortize the ~0.35us/step overhead, small enough to
    keep >= min_grid_steps 'parallel' grid steps at realistic M (v7x has 2 TCs) and
    to keep an f32 target_x block (tm x 1024 x 4B, double-buffered) inside v5e's
    scoped VMEM.  Never exceeds M (a block equal to the full dim is always legal)."""
    target = _round_up(max(1, pl.cdiv(M, min_grid_steps)), 256)
    tm = min(max_row_tile, target)
    if tm >= M:
        return M
    return tm   # multiple of 256 -> multiple of 8; ragged tail handled by cdiv grid


def decoder_forward(params, rep, target_x, *, row_tile=None,
                    max_row_tile=1024, min_grid_steps=4):
    """rep: [..., Hrep], target_x: [..., 1024] -> (dist, mu, sigma) like torch.

    `params` must come from prepare_decoder_params().  `row_tile`, if given, must be
    a multiple of 8 and <= M (used below to exercise the ragged-tail path)."""
    Hrep, D = params["Hrep"], params["D"]
    lead_shape = rep.shape[:-1]
    M = math.prod(lead_shape) if lead_shape else 1

    # No host-side dtype-cast or padding passes over the HBM-dominant operands.
    rep2 = rep.reshape(M, Hrep)
    tx2 = target_x.reshape(M, 1024)

    tm = row_tile if row_tile is not None else _choose_row_tile(
        M, max_row_tile, min_grid_steps)
    grid = (pl.cdiv(M, tm),)   # ragged last tile: OOB input rows are garbage that only
                               # reaches their own output rows, which are masked on store

    def row_spec(cols):
        return pl.BlockSpec((tm, cols), lambda i: (i, 0))

    def full_spec(shape):
        # constant block index -> block stays resident in VMEM across grid steps
        return pl.BlockSpec(shape, lambda i: (0, 0))

    # Advisory cost estimate (kernel is memory-bound; helps XLA scheduling only).
    flops = M * (2 * 1024 * D + 2 * Hrep * D + 2 * 2 * D * D + 2 * D * 2)
    bytes_accessed = (M * (1024 + Hrep + 2) * 4
                      + 4 * (Hrep * D + 1024 * D + 2 * D * D + D * 2 + 4 * D + 2))
    cost = pl.CostEstimate(flops=flops, transcendentals=2 * M,
                           bytes_accessed=bytes_accessed)

    out = pl.pallas_call(
        _decoder_kernel,
        out_shape=jax.ShapeDtypeStruct((M, 2), jnp.float32),
        grid_spec=pltpu.PrefetchScalarGridSpec(
            num_scalar_prefetch=0,
            grid=grid,
            in_specs=[
                row_spec(Hrep),                    # rep               (f32)
                row_spec(1024),                    # target_x          (f32, bf16 in-kernel)
                full_spec((Hrep, D)),              # w0_rep            (f32)
                full_spec((1024, D)),              # wp @ w0_tx        (f32, bf16 in-kernel)
                full_spec((1, D)),                 # bp @ w0_tx + b0   (f32)
                full_spec((D, D)),                 # w1
                full_spec((1, D)),                 # b1
                full_spec((D, D)),                 # w2
                full_spec((1, D)),                 # b2
                full_spec((D, 2)),                 # wf
                full_spec((1, 2)),                 # bf
            ],
            out_specs=pl.BlockSpec((tm, 2), lambda i: (i, 0)),
        ),
        compiler_params=pltpu.CompilerParams(
            dimension_semantics=("parallel",),
            vmem_limit_bytes=32 * 1024 * 1024),    # keeps tm=1024 f32 tiles safe on v5e
        cost_estimate=cost,
    )(rep2, tx2,
      params["w0_rep"], params["wtx_fold"], params["b0_fold"],
      params["w1"], params["b1"],
      params["w2"], params["b2"],
      params["wf"], params["bf"])

    mu = out[:, 0:1].reshape(*lead_shape, 1)
    sigma = out[:, 1:2].reshape(*lead_shape, 1)
    dist = IndependentNormalDiag(mu, sigma)
    return dist, mu, sigma


# --------------------------- pure-JAX reference ----------------------------- #
def decoder_reference(params, rep, target_x):
    tx = target_x @ params["wp"] + params["bp"]
    h = jnp.concatenate([rep, tx], axis=-1)
    h = jax.nn.relu(h @ params["w0"] + params["b0"])
    h = jax.nn.relu(h @ params["w1"] + params["b1"])
    h = jax.nn.relu(h @ params["w2"] + params["b2"])
    o = h @ params["wf"] + params["bf"]
    mu = o[..., 0:1]
    sigma = 0.1 + 0.9 * jax.nn.softplus(o[..., 1:2])
    return mu, sigma


# ---------------------------------- main ------------------------------------ #
if __name__ == "__main__":
    key = jax.random.PRNGKey(0)
    num_hidden = 32
    use_latent_path = False          # rep dim = num_hidden, hidden dim = 2*num_hidden
    batch, seq = 2, 8

    k_param, k_rep, k_tx, k_rep2, k_tx2 = jax.random.split(key, 5)
    params = prepare_decoder_params(
        init_decoder_params(k_param, num_hidden, use_latent_path))

    Hrep = params["Hrep"]
    rep = jax.random.normal(k_rep, (batch, seq, Hrep), jnp.float32)
    target_x = jax.random.normal(k_tx, (batch, seq, 1024), jnp.float32)

    # --- main small-shape run (single full-array tile) ---
    dist, mu, sigma = decoder_forward(params, rep, target_x)
    mu = jax.block_until_ready(mu)
    sigma = jax.block_until_ready(sigma)

    mu_ref, sigma_ref = decoder_reference(params, rep, target_x)
    assert mu.shape == (batch, seq, 1) and sigma.shape == (batch, seq, 1)
    # tolerances account for bf16 MXU operands on the K=1024 dot (f32 accumulation)
    assert jnp.allclose(mu, mu_ref, atol=5e-2, rtol=5e-2)
    assert jnp.allclose(sigma, sigma_ref, atol=5e-2, rtol=5e-2)
    assert bool(jnp.all(sigma > 0.1))
    _ = jax.block_until_ready(dist.log_prob(mu))     # distribution glue sanity check

    # --- ragged-tail run: M not a multiple of the row tile (cdiv grid, no padding) ---
    b2_, s2_ = 3, 50                                  # M = 150, row_tile = 64 -> 3 steps
    rep_r = jax.random.normal(k_rep2, (b2_, s2_, Hrep), jnp.float32)
    tx_r = jax.random.normal(k_tx2, (b2_, s2_, 1024), jnp.float32)
    _, mu_r, sigma_r = decoder_forward(params, rep_r, tx_r, row_tile=64)
    mu_r = jax.block_until_ready(mu_r)
    sigma_r = jax.block_until_ready(sigma_r)
    mu_rr, sigma_rr = decoder_reference(params, rep_r, tx_r)
    assert jnp.all(jnp.isfinite(mu_r)) and jnp.all(jnp.isfinite(sigma_r))
    assert jnp.allclose(mu_r, mu_rr, atol=5e-2, rtol=5e-2)
    assert jnp.allclose(sigma_r, sigma_rr, atol=5e-2, rtol=5e-2)

    print("KERNEL_OK")
</pallas_src>

<mosaic_0001>
module attributes {stable_mosaic.version = 11 : i64} {
  func.func @_decoder_kernel(%arg0: i32, %arg1: memref<16x32xf32, #tpu.memory_space<vmem>>, %arg2: memref<16x1024xf32, #tpu.memory_space<vmem>>, %arg3: memref<32x64xf32, #tpu.memory_space<vmem>>, %arg4: memref<1024x64xf32, #tpu.memory_space<vmem>>, %arg5: memref<1x64xf32, #tpu.memory_space<vmem>>, %arg6: memref<64x64xf32, #tpu.memory_space<vmem>>, %arg7: memref<1x64xf32, #tpu.memory_space<vmem>>, %arg8: memref<64x64xf32, #tpu.memory_space<vmem>>, %arg9: memref<1x64xf32, #tpu.memory_space<vmem>>, %arg10: memref<64x2xf32, #tpu.memory_space<vmem>>, %arg11: memref<1x2xf32, #tpu.memory_space<vmem>>, %arg12: memref<16x2xf32, #tpu.memory_space<vmem>>) attributes {dimension_semantics = [#tpu.dimension_semantics<parallel>], iteration_bounds = array<i64: 1>, scalar_prefetch = 0 : i64, scratch_operands = 0 : i64, tpu.core_type = #tpu.core_type<tc>, window_params = [{transform_indices = @transform_0, window_bounds = array<i64: 16, 32>}, {transform_indices = @transform_1, window_bounds = array<i64: 16, 1024>}, {pipeline_mode = #tpu.pipeline_mode<synchronous>, transform_indices = @transform_2, window_bounds = array<i64: 32, 64>}, {pipeline_mode = #tpu.pipeline_mode<synchronous>, transform_indices = @transform_3, window_bounds = array<i64: 1024, 64>}, {pipeline_mode = #tpu.pipeline_mode<synchronous>, transform_indices = @transform_4, window_bounds = array<i64: 1, 64>}, {pipeline_mode = #tpu.pipeline_mode<synchronous>, transform_indices = @transform_5, window_bounds = array<i64: 64, 64>}, {pipeline_mode = #tpu.pipeline_mode<synchronous>, transform_indices = @transform_6, window_bounds = array<i64: 1, 64>}, {pipeline_mode = #tpu.pipeline_mode<synchronous>, transform_indices = @transform_7, window_bounds = array<i64: 64, 64>}, {pipeline_mode = #tpu.pipeline_mode<synchronous>, transform_indices = @transform_8, window_bounds = array<i64: 1, 64>}, {pipeline_mode = #tpu.pipeline_mode<synchronous>, transform_indices = @transform_9, window_bounds = array<i64: 64, 2>}, {pipeline_mode = #tpu.pipeline_mode<synchronous>, transform_indices = @transform_10, window_bounds = array<i64: 1, 2>}, {transform_indices = @transform_11, window_bounds = array<i64: 16, 2>}]} {
    %c0 = arith.constant 0 : index
    %c0_0 = arith.constant 0 : index
    %0 = vector.load %arg2[%c0, %c0_0] : memref<16x1024xf32, #tpu.memory_space<vmem>>, vector<16x1024xf32>
    %1 = arith.truncf %0 : vector<16x1024xf32> to vector<16x1024xbf16>
    %c0_1 = arith.constant 0 : index
    %c0_2 = arith.constant 0 : index
    %2 = vector.load %arg4[%c0_1, %c0_2] : memref<1024x64xf32, #tpu.memory_space<vmem>>, vector<1024x64xf32>
    %3 = arith.truncf %2 : vector<1024x64xf32> to vector<1024x64xbf16>
    %cst = arith.constant dense<0.000000e+00> : vector<16x64xf32>
    %4 = tpu.matmul %1, %3, %cst {dimension_numbers = #tpu.dot_dimension_numbers<[1], [0], [0], [1], [0, 0, 1, 1], [], []>} : vector<16x1024xbf16>, vector<1024x64xbf16>, vector<16x64xf32> -> vector<16x64xf32>
    %c0_3 = arith.constant 0 : index
    %c0_4 = arith.constant 0 : index
    %5 = vector.load %arg1[%c0_3, %c0_4] : memref<16x32xf32, #tpu.memory_space<vmem>>, vector<16x32xf32>
    %c0_5 = arith.constant 0 : index
    %c0_6 = arith.constant 0 : index
    %6 = vector.load %arg3[%c0_5, %c0_6] : memref<32x64xf32, #tpu.memory_space<vmem>>, vector<32x64xf32>
    %cst_7 = arith.constant dense<0.000000e+00> : vector<16x64xf32>
    %7 = tpu.matmul %5, %6, %cst_7 {dimension_numbers = #tpu.dot_dimension_numbers<[1], [0], [0], [1], [0, 0, 1, 1], [], []>} : vector<16x32xf32>, vector<32x64xf32>, vector<16x64xf32> -> vector<16x64xf32>
    %8 = arith.addf %4, %7 : vector<16x64xf32>
    %c0_8 = arith.constant 0 : index
    %c0_9 = arith.constant 0 : index
    %9 = vector.load %arg5[%c0_8, %c0_9] : memref<1x64xf32, #tpu.memory_space<vmem>>, vector<1x64xf32>
    %10 = vector.broadcast %9 : vector<1x64xf32> to vector<16x64xf32>
    %11 = arith.addf %8, %10 : vector<16x64xf32>
    %cst_10 = arith.constant 0.000000e+00 : f32
    %12 = vector.broadcast %cst_10 : f32 to vector<16x64xf32>
    %13 = arith.maximumf %11, %12 : vector<16x64xf32>
    %c0_11 = arith.constant 0 : index
    %c0_12 = arith.constant 0 : index
    %14 = vector.load %arg6[%c0_11, %c0_12] : memref<64x64xf32, #tpu.memory_space<vmem>>, vector<64x64xf32>
    %cst_13 = arith.constant dense<0.000000e+00> : vector<16x64xf32>
    %15 = tpu.matmul %13, %14, %cst_13 {dimension_numbers = #tpu.dot_dimension_numbers<[1], [0], [0], [1], [0, 0, 1, 1], [], []>} : vector<16x64xf32>, vector<64x64xf32>, vector<16x64xf32> -> vector<16x64xf32>
    %c0_14 = arith.constant 0 : index
    %c0_15 = arith.constant 0 : index
    %16 = vector.load %arg7[%c0_14, %c0_15] : memref<1x64xf32, #tpu.memory_space<vmem>>, vector<1x64xf32>
    %17 = vector.broadcast %16 : vector<1x64xf32> to vector<16x64xf32>
    %18 = arith.addf %15, %17 : vector<16x64xf32>
    %cst_16 = arith.constant 0.000000e+00 : f32
    %19 = vector.broadcast %cst_16 : f32 to vector<16x64xf32>
    %20 = arith.maximumf %18, %19 : vector<16x64xf32>
    %c0_17 = arith.constant 0 : index
    %c0_18 = arith.constant 0 : index
    %21 = vector.load %arg8[%c0_17, %c0_18] : memref<64x64xf32, #tpu.memory_space<vmem>>, vector<64x64xf32>
    %cst_19 = arith.constant dense<0.000000e+00> : vector<16x64xf32>
    %22 = tpu.matmul %20, %21, %cst_19 {dimension_numbers = #tpu.dot_dimension_numbers<[1], [0], [0], [1], [0, 0, 1, 1], [], []>} : vector<16x64xf32>, vector<64x64xf32>, vector<16x64xf32> -> vector<16x64xf32>
    %c0_20 = arith.constant 0 : index
    %c0_21 = arith.constant 0 : index
    %23 = vector.load %arg9[%c0_20, %c0_21] : memref<1x64xf32, #tpu.memory_space<vmem>>, vector<1x64xf32>
    %24 = vector.broadcast %23 : vector<1x64xf32> to vector<16x64xf32>
    %25 = arith.addf %22, %24 : vector<16x64xf32>
    %cst_22 = arith.constant 0.000000e+00 : f32
    %26 = vector.broadcast %cst_22 : f32 to vector<16x64xf32>
    %27 = arith.maximumf %25, %26 : vector<16x64xf32>
    %c0_23 = arith.constant 0 : index
    %c0_24 = arith.constant 0 : index
    %28 = vector.load %arg10[%c0_23, %c0_24] : memref<64x2xf32, #tpu.memory_space<vmem>>, vector<64x2xf32>
    %cst_25 = arith.constant dense<0.000000e+00> : vector<16x2xf32>
    %29 = tpu.matmul %27, %28, %cst_25 {dimension_numbers = #tpu.dot_dimension_numbers<[1], [0], [0], [1], [0, 0, 1, 1], [], []>} : vector<16x64xf32>, vector<64x2xf32>, vector<16x2xf32> -> vector<16x2xf32>
    %c0_26 = arith.constant 0 : index
    %c0_27 = arith.constant 0 : index
    %30 = vector.load %arg11[%c0_26, %c0_27] : memref<1x2xf32, #tpu.memory_space<vmem>>, vector<1x2xf32>
    %31 = vector.broadcast %30 : vector<1x2xf32> to vector<16x2xf32>
    %32 = arith.addf %29, %31 : vector<16x2xf32>
    %33 = vector.extract_strided_slice %32 {offsets = [0, 0], sizes = [16, 1], strides = [1, 1]} : vector<16x2xf32> to vector<16x1xf32>
    %34 = vector.extract_strided_slice %32 {offsets = [0, 1], sizes = [16, 1], strides = [1, 1]} : vector<16x2xf32> to vector<16x1xf32>
    %cst_28 = arith.constant 0.000000e+00 : f32
    %35 = vector.broadcast %cst_28 : f32 to vector<16x1xf32>
    %36 = arith.maximumf %34, %35 : vector<16x1xf32>
    %37 = vector.broadcast %cst_28 : f32 to vector<16x1xf32>
    %38 = arith.subf %34, %37 : vector<16x1xf32>
    %39 = arith.cmpf one, %38, %38 : vector<16x1xf32>
    %40 = vector.broadcast %cst_28 : f32 to vector<16x1xf32>
    %41 = arith.addf %34, %40 : vector<16x1xf32>
    %42 = math.absf %38 : vector<16x1xf32>
    %cst_29 = arith.constant 0.000000e+00 : f32
    %43 = vector.broadcast %cst_29 : f32 to vector<16x1xf32>
    %44 = arith.subf %43, %42 : vector<16x1xf32>
    %45 = math.exp %44 : vector<16x1xf32>
    %46 = math.log1p %45 : vector<16x1xf32>
    %47 = arith.addf %36, %46 : vector<16x1xf32>
    %48 = arith.select %39, %41, %47 : vector<16x1xi1>, vector<16x1xf32>
    %cst_30 = arith.constant 0.899999976 : f32
    %49 = vector.broadcast %cst_30 : f32 to vector<16x1xf32>
    %50 = arith.mulf %49, %48 : vector<16x1xf32>
    %cst_31 = arith.constant 1.000000e-01 : f32
    %51 = vector.broadcast %cst_31 : f32 to vector<16x1xf32>
    %52 = arith.addf %51, %50 : vector<16x1xf32>
    %53 = tpu.concatenate %33, %52 in 1 : vector<16x1xf32>, vector<16x1xf32> -> vector<16x2xf32>
    %c0_32 = arith.constant 0 : index
    %c0_33 = arith.constant 0 : index
    %54 = vector.load %arg12[%c0_32, %c0_33] : memref<16x2xf32, #tpu.memory_space<vmem>>, vector<16x2xf32>
    tpu.vector_store %arg12[%c0_32, %c0_33], %53 {strides = array<i32>} : memref<16x2xf32, #tpu.memory_space<vmem>>, vector<16x2xf32>,
    return
  }
  func.func @transform_0(%arg0: i32) -> (i32, i32) {
    %c0_i32 = arith.constant 0 : i32
    %c0_i32_0 = arith.constant 0 : i32
    return %arg0, %c0_i32 : i32, i32
  }
  func.func @transform_1(%arg0: i32) -> (i32, i32) {
    %c0_i32 = arith.constant 0 : i32
    %c0_i32_0 = arith.constant 0 : i32
    return %arg0, %c0_i32 : i32, i32
  }
  func.func @transform_2(%arg0: i32) -> (i32, i32) {
    %c0_i32 = arith.constant 0 : i32
    %c0_i32_0 = arith.constant 0 : i32
    %c0_i32_1 = arith.constant 0 : i32
    return %c0_i32, %c0_i32_0 : i32, i32
  }
  func.func @transform_3(%arg0: i32) -> (i32, i32) {
    %c0_i32 = arith.constant 0 : i32
    %c0_i32_0 = arith.constant 0 : i32
    %c0_i32_1 = arith.constant 0 : i32
    return %c0_i32, %c0_i32_0 : i32, i32
  }
  func.func @transform_4(%arg0: i32) -> (i32, i32) {
    %c0_i32 = arith.constant 0 : i32
    %c0_i32_0 = arith.constant 0 : i32
    %c0_i32_1 = arith.constant 0 : i32
    return %c0_i32, %c0_i32_0 : i32, i32
  }
  func.func @transform_5(%arg0: i32) -> (i32, i32) {
    %c0_i32 = arith.constant 0 : i32
    %c0_i32_0 = arith.constant 0 : i32
    %c0_i32_1 = arith.constant 0 : i32
    return %c0_i32, %c0_i32_0 : i32, i32
  }
  func.func @transform_6(%arg0: i32) -> (i32, i32) {
    %c0_i32 = arith.constant 0 : i32
    %c0_i32_0 = arith.constant 0 : i32
    %c0_i32_1 = arith.constant 0 : i32
    return %c0_i32, %c0_i32_0 : i32, i32
  }
  func.func @transform_7(%arg0: i32) -> (i32, i32) {
    %c0_i32 = arith.constant 0 : i32
    %c0_i32_0 = arith.constant 0 : i32
    %c0_i32_1 = arith.constant 0 : i32
    return %c0_i32, %c0_i32_0 : i32, i32
  }
  func.func @transform_8(%arg0: i32) -> (i32, i32) {
    %c0_i32 = arith.constant 0 : i32
    %c0_i32_0 = arith.constant 0 : i32
    %c0_i32_1 = arith.constant 0 : i32
    return %c0_i32, %c0_i32_0 : i32, i32
  }
  func.func @transform_9(%arg0: i32) -> (i32, i32) {
    %c0_i32 = arith.constant 0 : i32
    %c0_i32_0 = arith.constant 0 : i32
    %c0_i32_1 = arith.constant 0 : i32
    return %c0_i32, %c0_i32_0 : i32, i32
  }
  func.func @transform_10(%arg0: i32) -> (i32, i32) {
    %c0_i32 = arith.constant 0 : i32
    %c0_i32_0 = arith.constant 0 : i32
    %c0_i32_1 = arith.constant 0 : i32
    return %c0_i32, %c0_i32_0 : i32, i32
  }
  func.func @transform_11(%arg0: i32) -> (i32, i32) {
    %c0_i32 = arith.constant 0 : i32
    %c0_i32_0 = arith.constant 0 : i32
    return %arg0, %c0_i32 : i32, i32
  }
}

</mosaic_0001>

<bundles_post_ra>
// kernel: tpu_custom_call.1
= control target key start
LH: loop header
LB: loop body
LE: loop exit
PB: predicated region body
PF: predicated region fallthrough
CT: control target
= control target key end

     0   :  { %vm261_vm0 = vcmask 261120   ;;  %vm533_vm1 = vcmask 523264   ;;  %vm851_vm6 = vcmask 7168   ;;  %vm854_vm7 = vcmask 15360   ;;  %s1737_s2 = inlined_call_operand.vmem [shape: f32[32,64], index: 2, kind: input, shape index: {}]   ;;  %s1738_s3 = inlined_call_operand.vmem [shape: f32[1024,64], index: 3, kind: input, shape index: {}]   ;;  %s1739_s0 = inlined_call_operand.vmem [shape: f32[16,32], index: 0, kind: input, shape index: {}]   ;;  %s1740_s1 = inlined_call_operand.vmem [shape: f32[16,1024], index: 1, kind: input, shape index: {}]   ;;  %s1741_s5 = inlined_call_operand.vmem [shape: f32[64,64], index: 5, kind: input, shape index: {}]   ;;  %s1742_s7 = inlined_call_operand.vmem [shape: f32[64,64], index: 7, kind: input, shape index: {}]   ;;  %s1743_s4 = inlined_call_operand.vmem [shape: f32[1,64], index: 4, kind: input, shape index: {}]   ;;  %s1744_s9 = inlined_call_operand.vmem [shape: f32[64,2], index: 9, kind: input, shape index: {}]   ;;  %s1745_s6 = inlined_call_operand.vmem [shape: f32[1,64], index: 6, kind: input, shape index: {}]   ;;  %s1746_s8 = inlined_call_operand.vmem [shape: f32[1,64], index: 8, kind: input, shape index: {}]   ;;  %s1747_s10 = inlined_call_operand.vmem [shape: f32[1,2], index: 10, kind: input, shape index: {}]   ;;  %s1748_s11 = inlined_call_operand.vmem [shape: f32[16,2], index: 11, kind: output, shape index: {}]  }
   0x1   :  { %v257_v0 = vld [vmem:[%s1737_s2] sm:$0xff]  ;;  %v258_v1 = vld [vmem:[%s1737_s2 + $0x8] sm:$0xff]  ;;  %v259_v9 = vld [vmem:[%s1737_s2 + $0x10] sm:$0xff] }
   0x2   :  { %v79_v2 = vld [vmem:[%s1738_s3 + $0x80] sm:$0xff]  ;;  %v1065_v3 = vpack.c.bf16 %v258_v1, %v257_v0  ;;  %v80_v4 = vld [vmem:[%s1738_s3 + $0x88] sm:$0xff]  ;;  %v260_v10 = vld [vmem:[%s1737_s2 + $0x18] sm:$0xff] }
   0x3   :  { %v63_v5 = vld [vmem:[%s1738_s3] sm:$0xff]  ;;  %v64_v6 = vld [vmem:[%s1738_s3 + $0x8] sm:$0xff]  ;;  %v199_v7 = vpack.c.bf16 %v80_v4, %v79_v2  ;;  %v81_v11 = vld [vmem:[%s1738_s3 + $0x90] sm:$0xff]  ;;  %v1069_v12 = vpack.c.bf16 %v260_v10, %v259_v9 }
   0x4   :  { %v191_v8 = vpack.c.bf16 %v64_v6, %v63_v5  ;;  %1066 = vmatprep.subr.bf16.mxu0 %v1065_v3  ;;  %v82_v13 = vld [vmem:[%s1738_s3 + $0x98] sm:$0xff]  ;;  %v65_v14 = vld [vmem:[%s1738_s3 + $0x10] sm:$0xff]  ;;  %v255_v17 = vld [vmem:[%s1739_s0] sm:$0xff] }
   0x5   :  { %v66_v15 = vld [vmem:[%s1738_s3 + $0x18] sm:$0xff]  ;;  %879 = vmatprep.subr.bf16.mxu1 %v199_v7  ;;  %1068 = vmatpush3.bf16.msra.mxu0 %v1065_v3  ;;  %v200_v16 = vpack.c.bf16 %v82_v13, %v81_v11  ;;  %v83_v18 = vld [vmem:[%s1738_s3 + $0xa0] sm:$0xff]  ;;  %v84_v20 = vld [vmem:[%s1738_s3 + $0xa8] sm:$0xff] }
   0x6   :  { %880 = vmatpush3.bf16.msra.mxu1 %v191_v8  ;;  %1070 = vmatprep.subr.bf16.mxu0 %v1069_v12  ;;  %v192_v19 = vpack.c.bf16 %v66_v15, %v65_v14  ;;  %v111_v21 = vld [vmem:[%s1738_s3 + $0x180] sm:$0xff]  ;;  %v112_v22 = vld [vmem:[%s1738_s3 + $0x188] sm:$0xff]  ;;  %v201_v23 = vpack.c.bf16 %v84_v20, %v83_v18  ;;  %v85_v29 = vld [vmem:[%s1738_s3 + $0xb0] sm:$0xff] }
   0x7   :  { %881 = vmatprep.subr.bf16.mxu1 %v200_v16  ;;  %1005 = vmatprep.mubr.msk.f32.mxu0 %vm261_vm0, %v255_v17  ;;  %v215_v24 = vpack.c.bf16 %v112_v22, %v111_v21  ;;  %v67_v25 = vld [vmem:[%s1738_s3 + $0x20] sm:$0xff]  ;;  %v68_v26 = vld [vmem:[%s1738_s3 + $0x28] sm:$0xff]  ;;  %v86_v30 = vld [vmem:[%s1738_s3 + $0xb8] sm:$0xff] }
   0x8   :  { %v95_v27 = vld [vmem:[%s1738_s3 + $0x100] sm:$0xff]  ;;  %v96_v28 = vld [vmem:[%s1738_s3 + $0x108] sm:$0xff]  ;;  %v113_v33 = vld [vmem:[%s1738_s3 + $0x190] sm:$0xff]  ;;  %v193_v35 = vpack.c.bf16 %v68_v26, %v67_v25  ;;  %v202_v39 = vpack.c.bf16 %v86_v30, %v85_v29 }
   0x9   :  { %1072 = vmatpush3.bf16.msra.mxu0 %v1069_v12  ;;  %v256_v31 = vld [vmem:[%s1739_s0 + $0x8] sm:$0xff]  ;;  %v207_v32 = vpack.c.bf16 %v96_v28, %v95_v27  ;;  %v114_v34 = vld [vmem:[%s1738_s3 + $0x198] sm:$0xff]  ;;  %v97_v37 = vld [vmem:[%s1738_s3 + $0x110] sm:$0xff] }
   0xa   :  { %882 = vmatpush3.bf16.msra.mxu1 %v192_v19  ;;  %901 = vmatprep.subr.bf16.mxu0 %v215_v24  ;;  %v216_v36 = vpack.c.bf16 %v114_v34, %v113_v33  ;;  %v98_v38 = vld [vmem:[%s1738_s3 + $0x118] sm:$0xff]  ;;  %v69_v40 = vld [vmem:[%s1738_s3 + $0x30] sm:$0xff]  ;;  %v115_v42 = vld [vmem:[%s1738_s3 + $0x1a0] sm:$0xff] }
   0xb   :  { %883 = vmatprep.subr.bf16.mxu1 %v201_v23  ;;  %v70_v41 = vld [vmem:[%s1738_s3 + $0x38] sm:$0xff]  ;;  %v87_v43 = vld [vmem:[%s1738_s3 + $0xc0] sm:$0xff]  ;;  %v88_v44 = vld [vmem:[%s1738_s3 + $0xc8] sm:$0xff]  ;;  %v208_v46 = vpack.c.bf16 %v98_v38, %v97_v37 }
   0xc   :  { %1006 = vmatmul.mubr.msk.f32.vlgmr.msra.gmra.mrb[0].mxu0 %vm261_vm0, %v256_v31  ;;  %v116_v45 = vld [vmem:[%s1738_s3 + $0x1a8] sm:$0xff]  ;;  %v194_v47 = vpack.c.bf16 %v70_v41, %v69_v40  ;;  %v71_v49 = vld [vmem:[%s1738_s3 + $0x40] sm:$0xff]  ;;  %v203_v52 = vpack.c.bf16 %v88_v44, %v87_v43  ;;  %v117_v54 = vld [vmem:[%s1738_s3 + $0x1b0] sm:$0xff] }
   0xd   :  { %902 = vmatpush3.bf16.msra.mxu0 %v207_v32  ;;  %v217_v48 = vpack.c.bf16 %v116_v45, %v115_v42  ;;  %v99_v50 = vld [vmem:[%s1738_s3 + $0x120] sm:$0xff]  ;;  %v100_v51 = vld [vmem:[%s1738_s3 + $0x128] sm:$0xff]  ;;  %v118_v55 = vld [vmem:[%s1738_s3 + $0x1b8] sm:$0xff] }
   0xe   :  { %884 = vmatpush3.bf16.msra.mxu1 %v193_v35  ;;  %903 = vmatprep.subr.bf16.mxu0 %v216_v36  ;;  %v72_v53 = vld [vmem:[%s1738_s3 + $0x48] sm:$0xff]  ;;  %v89_v56 = vld [vmem:[%s1738_s3 + $0xd0] sm:$0xff]  ;;  %v90_v57 = vld [vmem:[%s1738_s3 + $0xd8] sm:$0xff]  ;;  %v209_v58 = vpack.c.bf16 %v100_v51, %v99_v50  ;;  %v218_v60 = vpack.c.bf16 %v118_v55, %v117_v54 }
   0xf   :  { %885 = vmatprep.subr.bf16.mxu1 %v202_v39  ;;  %v195_v59 = vpack.c.bf16 %v72_v53, %v71_v49  ;;  %v73_v61 = vld [vmem:[%s1738_s3 + $0x50] sm:$0xff]  ;;  %v102_v63 = vld [vmem:[%s1738_s3 + $0x138] sm:$0xff]  ;;  %v204_v0 = vpack.c.bf16 %v90_v57, %v89_v56  ;;  %v119_v2 = vld [vmem:[%s1738_s3 + $0x1c0] sm:$0xff] }
  0x10   :  { %v101_v62 = vld [vmem:[%s1738_s3 + $0x130] sm:$0xff]  ;;  %v74_v1 = vld [vmem:[%s1738_s3 + $0x58] sm:$0xff]  ;;  %v120_v3 = vld [vmem:[%s1738_s3 + $0x1c8] sm:$0xff] }
  0x11   :  { %904 = vmatpush3.bf16.msra.mxu0 %v208_v46  ;;  %v91_v4 = vld [vmem:[%s1738_s3 + $0xe0] sm:$0xff]  ;;  %v92_v5 = vld [vmem:[%s1738_s3 + $0xe8] sm:$0xff]  ;;  %v210_v6 = vpack.c.bf16 %v102_v63, %v101_v62  ;;  %v196_v9 = vpack.c.bf16 %v74_v1, %v73_v61  ;;  %v219_v10 = vpack.c.bf16 %v120_v3, %v119_v2  ;;  %v121_v16 = vld [vmem:[%s1738_s3 + $0x1d0] sm:$0xff] }
  0x12   :  { %886 = vmatpush3.bf16.msra.mxu1 %v194_v47  ;;  %905 = vmatprep.subr.bf16.mxu0 %v217_v48  ;;  %v75_v7 = vld [vmem:[%s1738_s3 + $0x60] sm:$0xff]  ;;  %v40_v8 = vld [vmem:[%s1740_s1 + $0x8] sm:$0xff]  ;;  %v205_v14 = vpack.c.bf16 %v92_v5, %v91_v4  ;;  %v122_v17 = vld [vmem:[%s1738_s3 + $0x1d8] sm:$0xff] }
  0x13   :  { %887 = vmatprep.subr.bf16.mxu1 %v203_v52  ;;  %v103_v11 = vld [vmem:[%s1738_s3 + $0x140] sm:$0xff]  ;;  %v104_v12 = vld [vmem:[%s1738_s3 + $0x148] sm:$0xff]  ;;  %v93_v19 = vld [vmem:[%s1738_s3 + $0xf0] sm:$0xff]  ;;  %v220_v24 = vpack.c.bf16 %v122_v17, %v121_v16 }
  0x14   :  { %v48_v13 = vld [vmem:[%s1740_s1 + $0x48] sm:$0xff]  ;;  %v94_v20 = vld [vmem:[%s1738_s3 + $0xf8] sm:$0xff]  ;;  %v211_v21 = vpack.c.bf16 %v104_v12, %v103_v11  ;;  %v77_v22 = vld [vmem:[%s1738_s3 + $0x70] sm:$0xff] }
  0x15   :  { %906 = vmatpush3.bf16.msra.mxu0 %v209_v58  ;;  %v76_v15 = vld [vmem:[%s1738_s3 + $0x68] sm:$0xff]  ;;  %v56_v18 = vpack.c.bf16 %v48_v13, %v40_v8  ;;  %v78_v25 = vld [vmem:[%s1738_s3 + $0x78] sm:$0xff]  ;;  %v105_v26 = vld [vmem:[%s1738_s3 + $0x150] sm:$0xff]  ;;  %v206_v28 = vpack.c.bf16 %v94_v20, %v93_v19 }
  0x16   :  { %888 = vmatpush3.bf16.msra.mxu1 %v195_v59  ;;  %907 = vmatprep.subr.bf16.mxu0 %v218_v60  ;;  %v197_v23 = vpack.c.bf16 %v76_v15, %v75_v7  ;;  %v106_v27 = vld [vmem:[%s1738_s3 + $0x158] sm:$0xff]  ;;  %v123_v29 = vld [vmem:[%s1738_s3 + $0x1e0] sm:$0xff]  ;;  %v124_v30 = vld [vmem:[%s1738_s3 + $0x1e8] sm:$0xff]  ;;  %v198_v39 = vpack.c.bf16 %v78_v25, %v77_v22 }
  0x17   :  { %889 = vmatprep.subr.bf16.mxu1 %v204_v0  ;;  %375 = vmatprep.mubr.bf16.mxu1 %v56_v18  ;;  %v143_v31 = vld [vmem:[%s1738_s3 + $0x280] sm:$0xff]  ;;  %v144_v32 = vld [vmem:[%s1738_s3 + $0x288] sm:$0xff]  ;;  %v42_v33 = vld [vmem:[%s1740_s1 + $0x18] sm:$0xff]  ;;  %v212_v35 = vpack.c.bf16 %v106_v27, %v105_v26  ;;  %v221_v40 = vpack.c.bf16 %v124_v30, %v123_v29 }
  0x18   :  { %v50_v34 = vld [vmem:[%s1740_s1 + $0x58] sm:$0xff]  ;;  %v39_v36 = vld [vmem:[%s1740_s1] sm:$0xff]  ;;  %v108_v42 = vld [vmem:[%s1738_s3 + $0x168] sm:$0xff]  ;;  %v231_v44 = vpack.c.bf16 %v144_v32, %v143_v31 }
  0x19   :  { %908 = vmatpush3.bf16.msra.mxu0 %v210_v6  ;;  %v47_v37 = vld [vmem:[%s1740_s1 + $0x40] sm:$0xff]  ;;  %v58_v38 = vpack.c.bf16 %v50_v34, %v42_v33  ;;  %v128_v45 = vld [vmem:[%s1738_s3 + $0x208] sm:$0xff]  ;;  %v125_v46 = vld [vmem:[%s1738_s3 + $0x1f0] sm:$0xff] }
  0x1a   :  { %890 = vmatpush3.bf16.msra.mxu1 %v196_v9  ;;  %909 = vmatprep.subr.bf16.mxu0 %v219_v10  ;;  %v107_v41 = vld [vmem:[%s1738_s3 + $0x160] sm:$0xff]  ;;  %v126_v47 = vld [vmem:[%s1738_s3 + $0x1f8] sm:$0xff]  ;;  %v145_v48 = vld [vmem:[%s1738_s3 + $0x290] sm:$0xff]  ;;  %v55_v50 = vpack.c.bf16 %v47_v37, %v39_v36 }
  0x1b   :  { %891 = vmatprep.subr.bf16.mxu1 %v205_v14  ;;  %v127_v43 = vld [vmem:[%s1738_s3 + $0x200] sm:$0xff]  ;;  %416 = vmatprep.mubr.bf16.mxu0 %v58_v38  ;;  %v146_v49 = vld [vmem:[%s1738_s3 + $0x298] sm:$0xff]  ;;  %v213_v51 = vpack.c.bf16 %v108_v42, %v107_v41  ;;  %v222_v53 = vpack.c.bf16 %v126_v47, %v125_v46  ;;  %v109_v54 = vld [vmem:[%s1738_s3 + $0x170] sm:$0xff] }
  0x1c   :  { %v223_v52 = vpack.c.bf16 %v128_v45, %v127_v43  ;;  %v110_v55 = vld [vmem:[%s1738_s3 + $0x178] sm:$0xff]  ;;  %v129_v56 = vld [vmem:[%s1738_s3 + $0x210] sm:$0xff]  ;;  %v232_v57 = vpack.c.bf16 %v146_v49, %v145_v48  ;;  %v175_v59 = vld [vmem:[%s1738_s3 + $0x380] sm:$0xff] }
  0x1d   :  { %910 = vmatpush3.bf16.msra.mxu0 %v211_v21  ;;  %v130_v58 = vld [vmem:[%s1738_s3 + $0x218] sm:$0xff]  ;;  %v176_v60 = vld [vmem:[%s1738_s3 + $0x388] sm:$0xff]  ;;  %v147_v61 = vld [vmem:[%s1738_s3 + $0x2a0] sm:$0xff]  ;;  %v214_v63 = vpack.c.bf16 %v110_v55, %v109_v54 }
  0x1e   :  { %892 = vmatpush3.bf16.msra.mxu1 %v197_v23  ;;  %911 = vmatprep.subr.bf16.mxu0 %v220_v24  ;;  %v148_v62 = vld [vmem:[%s1738_s3 + $0x2a8] sm:$0xff]  ;;  %v41_v0 = vld [vmem:[%s1740_s1 + $0x10] sm:$0xff]  ;;  %v224_v2 = vpack.c.bf16 %v130_v58, %v129_v56  ;;  %v247_v3 = vpack.c.bf16 %v176_v60, %v175_v59  ;;  %v131_v4 = vld [vmem:[%s1738_s3 + $0x220] sm:$0xff] }
  0x1f   :  { %893 = vmatprep.subr.bf16.mxu1 %v206_v28  ;;  %v49_v1 = vld [vmem:[%s1740_s1 + $0x50] sm:$0xff]  ;;  %v159_v5 = vld [vmem:[%s1738_s3 + $0x300] sm:$0xff]  ;;  %v160_v6 = vld [vmem:[%s1738_s3 + $0x308] sm:$0xff]  ;;  %v233_v7 = vpack.c.bf16 %v148_v62, %v147_v61 }
  0x20   :  { %v132_v8 = vld [vmem:[%s1738_s3 + $0x228] sm:$0xff]  ;;  %v177_v9 = vld [vmem:[%s1738_s3 + $0x390] sm:$0xff]  ;;  %v178_v10 = vld [vmem:[%s1738_s3 + $0x398] sm:$0xff]  ;;  %v57_v11 = vpack.c.bf16 %v49_v1, %v41_v0  ;;  %v239_v14 = vpack.c.bf16 %v160_v6, %v159_v5 }
  0x21   :  { %912 = vmatpush3.bf16.msra.mxu0 %v212_v35  ;;  %v149_v12 = vld [vmem:[%s1738_s3 + $0x2b0] sm:$0xff]  ;;  %v150_v13 = vld [vmem:[%s1738_s3 + $0x2b8] sm:$0xff]  ;;  %v225_v15 = vpack.c.bf16 %v132_v8, %v131_v4  ;;  %v248_v16 = vpack.c.bf16 %v178_v10, %v177_v9  ;;  %v179_v22 = vld [vmem:[%s1738_s3 + $0x3a0] sm:$0xff] }
  0x22   :  { %894 = vmatpush3.bf16.msra.mxu1 %v198_v39  ;;  %913 = vmatprep.subr.bf16.mxu0 %v221_v40  ;;  %v133_v17 = vld [vmem:[%s1738_s3 + $0x230] sm:$0xff]  ;;  %v162_v19 = vld [vmem:[%s1738_s3 + $0x318] sm:$0xff]  ;;  %v234_v20 = vpack.c.bf16 %v150_v13, %v149_v12  ;;  %v180_v23 = vld [vmem:[%s1738_s3 + $0x3a8] sm:$0xff] }
  0x23   :  { %923 = vmatprep.subr.bf16.mxu1 %v231_v44  ;;  %v161_v18 = vld [vmem:[%s1738_s3 + $0x310] sm:$0xff]  ;;  %v134_v21 = vld [vmem:[%s1738_s3 + $0x238] sm:$0xff]  ;;  %v151_v24 = vld [vmem:[%s1738_s3 + $0x2c0] sm:$0xff]  ;;  %v249_v30 = vpack.c.bf16 %v180_v23, %v179_v22 }
  0x24   :  { %v152_v25 = vld [vmem:[%s1738_s3 + $0x2c8] sm:$0xff]  ;;  %v240_v26 = vpack.c.bf16 %v162_v19, %v161_v18  ;;  %v135_v27 = vld [vmem:[%s1738_s3 + $0x240] sm:$0xff]  ;;  %v226_v29 = vpack.c.bf16 %v134_v21, %v133_v17  ;;  %v181_v36 = vld [vmem:[%s1738_s3 + $0x3b0] sm:$0xff] }
  0x25   :  { %376 = vmatmul.mubr.bf16.vlgmr.msra.gmra.mrb[0].mxu1 %v55_v50  ;;  %914 = vmatpush3.bf16.msra.mxu0 %v213_v51  ;;  %v44_v28 = vld [vmem:[%s1740_s1 + $0x28] sm:$0xff]  ;;  %v163_v31 = vld [vmem:[%s1738_s3 + $0x320] sm:$0xff]  ;;  %v235_v34 = vpack.c.bf16 %v152_v25, %v151_v24  ;;  %v182_v37 = vld [vmem:[%s1738_s3 + $0x3b8] sm:$0xff] }
  0x26   :  { %924 = vmatpush3.bf16.msra.mxu1 %v223_v52  ;;  %915 = vmatprep.subr.bf16.mxu0 %v222_v53  ;;  %v164_v32 = vld [vmem:[%s1738_s3 + $0x328] sm:$0xff]  ;;  %v153_v39 = vld [vmem:[%s1738_s3 + $0x2d0] sm:$0xff]  ;;  %v154_v40 = vld [vmem:[%s1738_s3 + $0x2d8] sm:$0xff]  ;;  %v250_v45 = vpack.c.bf16 %v182_v37, %v181_v36 }
  0x27   :  { %925 = vmatprep.subr.bf16.mxu1 %v232_v57  ;;  %v52_v33 = vld [vmem:[%s1740_s1 + $0x68] sm:$0xff]  ;;  %v241_v41 = vpack.c.bf16 %v164_v32, %v163_v31  ;;  %v137_v42 = vld [vmem:[%s1738_s3 + $0x250] sm:$0xff]  ;;  %v46_v43 = vld [vmem:[%s1740_s1 + $0x38] sm:$0xff]  ;;  %v236_v49 = vpack.c.bf16 %v154_v40, %v153_v39 }
  0x28   :  { %v136_v35 = vld [vmem:[%s1738_s3 + $0x248] sm:$0xff]  ;;  %v60_v38 = vpack.c.bf16 %v52_v33, %v44_v28  ;;  %v165_v46 = vld [vmem:[%s1738_s3 + $0x330] sm:$0xff]  ;;  %v166_v47 = vld [vmem:[%s1738_s3 + $0x338] sm:$0xff] }
  0x29   :  { %916 = vmatpush3.bf16.msra.mxu0 %v214_v63  ;;  %v227_v44 = vpack.c.bf16 %v136_v35, %v135_v27  ;;  %v54_v48 = vld [vmem:[%s1740_s1 + $0x78] sm:$0xff]  ;;  %v183_v51 = vld [vmem:[%s1738_s3 + $0x3c0] sm:$0xff]  ;;  %v184_v52 = vld [vmem:[%s1738_s3 + $0x3c8] sm:$0xff]  ;;  %v242_v56 = vpack.c.bf16 %v166_v47, %v165_v46 }
  0x2a   :  { %926 = vmatpush3.bf16.msra.mxu1 %v224_v2  ;;  %945 = vmatprep.subr.bf16.mxu0 %v247_v3  ;;  %v138_v50 = vld [vmem:[%s1738_s3 + $0x258] sm:$0xff]  ;;  %v62_v53 = vpack.c.bf16 %v54_v48, %v46_v43  ;;  %v155_v54 = vld [vmem:[%s1738_s3 + $0x2e0] sm:$0xff]  ;;  %v156_v55 = vld [vmem:[%s1738_s3 + $0x2e8] sm:$0xff]  ;;  %v251_v58 = vpack.c.bf16 %v184_v52, %v183_v51 }
  0x2b   :  { %927 = vmatprep.subr.bf16.mxu1 %v233_v7  ;;  %457 = vmatprep.mubr.bf16.mxu1 %v60_v38  ;;  %v228_v57 = vpack.c.bf16 %v138_v50, %v137_v42  ;;  %v139_v59 = vld [vmem:[%s1738_s3 + $0x260] sm:$0xff]  ;;  %v168_v61 = vld [vmem:[%s1738_s3 + $0x348] sm:$0xff]  ;;  %v237_v62 = vpack.c.bf16 %v156_v55, %v155_v54  ;;  %v185_v0 = vld [vmem:[%s1738_s3 + $0x3d0] sm:$0xff] }
  0x2c   :  { %417 = vmatmul.mubr.bf16.vlgmr.msra.gmra.mrb[4].mxu0 %v57_v11  ;;  %v167_v60 = vld [vmem:[%s1738_s3 + $0x340] sm:$0xff]  ;;  %v140_v63 = vld [vmem:[%s1738_s3 + $0x268] sm:$0xff]  ;;  %v186_v1 = vld [vmem:[%s1738_s3 + $0x3d8] sm:$0xff] }
  0x2d   :  { %946 = vmatpush3.bf16.msra.mxu0 %v239_v14  ;;  %498 = vmatprep.mubr.bf16.mxu0 %v62_v53  ;;  %v157_v2 = vld [vmem:[%s1738_s3 + $0x2f0] sm:$0xff]  ;;  %v158_v3 = vld [vmem:[%s1738_s3 + $0x2f8] sm:$0xff]  ;;  %v243_v4 = vpack.c.bf16 %v168_v61, %v167_v60  ;;  %v229_v5 = vpack.c.bf16 %v140_v63, %v139_v59  ;;  %v252_v6 = vpack.c.bf16 %v186_v1, %v185_v0  ;;  %v187_v12 = vld [vmem:[%s1738_s3 + $0x3e0] sm:$0xff] }
  0x2e   :  { %928 = vmatpush3.bf16.msra.mxu1 %v225_v15  ;;  %947 = vmatprep.subr.bf16.mxu0 %v248_v16  ;;  %v141_v7 = vld [vmem:[%s1738_s3 + $0x270] sm:$0xff]  ;;  %v170_v9 = vld [vmem:[%s1738_s3 + $0x358] sm:$0xff]  ;;  %v238_v10 = vpack.c.bf16 %v158_v3, %v157_v2  ;;  %v188_v13 = vld [vmem:[%s1738_s3 + $0x3e8] sm:$0xff] }
  0x2f   :  { %929 = vmatprep.subr.bf16.mxu1 %v234_v20  ;;  %v169_v8 = vld [vmem:[%s1738_s3 + $0x350] sm:$0xff]  ;;  %v142_v11 = vld [vmem:[%s1738_s3 + $0x278] sm:$0xff]  ;;  %v43_v15 = vld [vmem:[%s1740_s1 + $0x20] sm:$0xff]  ;;  %v253_v18 = vpack.c.bf16 %v188_v13, %v187_v12 }
  0x30   :  { %v244_v14 = vpack.c.bf16 %v170_v9, %v169_v8  ;;  %v230_v16 = vpack.c.bf16 %v142_v11, %v141_v7  ;;  %v51_v17 = vld [vmem:[%s1740_s1 + $0x60] sm:$0xff]  ;;  %v172_v20 = vld [vmem:[%s1738_s3 + $0x368] sm:$0xff]  ;;  %v189_v21 = vld [vmem:[%s1738_s3 + $0x3f0] sm:$0xff] }
  0x31   :  { %948 = vmatpush3.bf16.msra.mxu0 %v240_v26  ;;  %v171_v19 = vld [vmem:[%s1738_s3 + $0x360] sm:$0xff]  ;;  %v190_v22 = vld [vmem:[%s1738_s3 + $0x3f8] sm:$0xff]  ;;  %v59_v23 = vpack.c.bf16 %v51_v17, %v43_v15  ;;  %v173_v26 = vld [vmem:[%s1738_s3 + $0x370] sm:$0xff] }
  0x32   :  { %930 = vmatpush3.bf16.msra.mxu1 %v226_v29  ;;  %949 = vmatprep.subr.bf16.mxu0 %v249_v30  ;;  %v245_v24 = vpack.c.bf16 %v172_v20, %v171_v19  ;;  %v254_v25 = vpack.c.bf16 %v190_v22, %v189_v21  ;;  %v174_v27 = vld [vmem:[%s1738_s3 + $0x378] sm:$0xff]  ;;  %v45_v29 = vld [vmem:[%s1740_s1 + $0x30] sm:$0xff]  ;;  %v518_v32 = vld [vmem:[%s1741_s5] sm:$0xff] }
  0x33   :  { %931 = vmatprep.subr.bf16.mxu1 %v235_v34  ;;  %v246_v28 = vpack.c.bf16 %v174_v27, %v173_v26  ;;  %v53_v30 = vld [vmem:[%s1740_s1 + $0x70] sm:$0xff]  ;;  %v519_v33 = vld [vmem:[%s1741_s5 + $0x8] sm:$0xff]  ;;  %v521_v36 = vld [vmem:[%s1741_s5 + $0x18] sm:$0xff] }
  0x34   :  { %v61_v31 = vpack.c.bf16 %v53_v30, %v45_v29  ;;  %v1073_v34 = vpack.c.bf16 %v519_v33, %v518_v32  ;;  %v520_v35 = vld [vmem:[%s1741_s5 + $0x10] sm:$0xff]  ;;  %v522_v38 = vld [vmem:[%s1741_s5 + $0x20] sm:$0xff]  ;;  %v523_v39 = vld [vmem:[%s1741_s5 + $0x28] sm:$0xff] }
  0x35   :  { %950 = vmatpush3.bf16.msra.mxu0 %v241_v41  ;;  %v1077_v37 = vpack.c.bf16 %v521_v36, %v520_v35  ;;  %v1081_v40 = vpack.c.bf16 %v523_v39, %v522_v38  ;;  %v524_v41 = vld [vmem:[%s1741_s5 + $0x30] sm:$0xff]  ;;  %v525_v42 = vld [vmem:[%s1741_s5 + $0x38] sm:$0xff]  ;;  %v621_v50 = vld [vmem:[%s1742_s7 + $0x20] sm:$0xff] }
  0x36   :  { %932 = vmatpush3.bf16.msra.mxu1 %v227_v44  ;;  %951 = vmatprep.subr.bf16.mxu0 %v250_v45  ;;  %v1085_v43 = vpack.c.bf16 %v525_v42, %v524_v41  ;;  %v617_v44 = vld [vmem:[%s1742_s7] sm:$0xff]  ;;  %v618_v45 = vld [vmem:[%s1742_s7 + $0x8] sm:$0xff]  ;;  %v619_v46 = vld [vmem:[%s1742_s7 + $0x10] sm:$0xff] }
  0x37   :  { %933 = vmatprep.subr.bf16.mxu1 %v236_v49  ;;  %v1089_v47 = vpack.c.bf16 %v618_v45, %v617_v44  ;;  %v620_v48 = vld [vmem:[%s1742_s7 + $0x18] sm:$0xff]  ;;  %v622_v51 = vld [vmem:[%s1742_s7 + $0x28] sm:$0xff]  ;;  %v863_v19 = vld [vmem:[%s1743_s4] ss:$0 sm:$0xff] }
  0x38   :  { %v1093_v49 = vpack.c.bf16 %v620_v48, %v619_v46  ;;  %v1097_v52 = vpack.c.bf16 %v622_v51, %v621_v50  ;;  %v624_v29 = vld [vmem:[%s1742_s7 + $0x38] sm:$0xff]  ;;  %v716_v32 = vld [vmem:[%s1744_s9 + $0x8] sm:$0xff]  ;;  %v717_v33 = vld [vmem:[%s1744_s9 + $0x10] sm:$0xff] }
  0x39   :  { %952 = vmatpush3.bf16.msra.mxu0 %v242_v56  ;;  %v718_v35 = vld [vmem:[%s1744_s9 + $0x18] sm:$0xff]  ;;  %v720_v38 = vld [vmem:[%s1744_s9 + $0x28] sm:$0xff]  ;;  %v867_v50 = vld [vmem:[%s1746_s8] ss:$0 sm:$0xff] }
  0x3a   :  { %934 = vmatpush3.bf16.msra.mxu1 %v228_v57  ;;  %953 = vmatprep.subr.bf16.mxu0 %v251_v58  ;;  %v1109_v36 = vpack.c.bf16 %v718_v35, %v717_v33  ;;  %v722_v48 = vld [vmem:[%s1744_s9 + $0x38] sm:$0xff] }
  0x3b   :  { %935 = vmatprep.subr.bf16.mxu1 %v237_v62 }
  0x3d   :  { %954 = vmatpush3.bf16.msra.mxu0 %v243_v4 }
  0x3e   :  { %936 = vmatpush3.bf16.msra.mxu1 %v229_v5  ;;  %955 = vmatprep.subr.bf16.mxu0 %v252_v6 }
  0x3f   :  { %937 = vmatprep.subr.bf16.mxu1 %v238_v10 }
  0x41   :  { %956 = vmatpush3.bf16.msra.mxu0 %v244_v14 }
  0x42   :  { %938 = vmatpush3.bf16.msra.mxu1 %v230_v16  ;;  %957 = vmatprep.subr.bf16.mxu0 %v253_v18 }
  0x43   :  { %1074 = vmatprep.subr.bf16.mxu1 %v1073_v34 }
  0x45   :  { %458 = vmatmul.mubr.bf16.vlgmr.msra.gmra.mrb[4].mxu1 %v59_v23  ;;  %958 = vmatpush3.bf16.msra.mxu0 %v245_v24 }
  0x46   :  { %959 = vmatprep.subr.bf16.mxu0 %v254_v25  ;;  %1076 = vmatpush3.bf16.msra.mxu1 %v1073_v34 }
  0x47   :  { %1078 = vmatprep.subr.bf16.mxu1 %v1077_v37 }
  0x49   :  { %960 = vmatpush3.bf16.msra.mxu0 %v246_v28  ;;  %v623_v28 = vld [vmem:[%s1742_s7 + $0x30] sm:$0xff] }
  0x4a   :  { %1080 = vmatpush3.bf16.msra.mxu1 %v1077_v37  ;;  %1090 = vmatprep.subr.bf16.mxu0 %v1089_v47  ;;  %v1101_v30 = vpack.c.bf16 %v624_v29, %v623_v28  ;;  %v719_v37 = vld [vmem:[%s1744_s9 + $0x20] sm:$0xff] }
  0x4b   :  { %1082 = vmatprep.subr.bf16.mxu1 %v1081_v40  ;;  %v1113_v39 = vpack.c.bf16 %v720_v38, %v719_v37 }
  0x4c   :  { %499 = vmatmul.mubr.bf16.vlgmr.msra.gmra.mrb[8].mxu0 %v61_v31  ;;  %v715_v31 = vld [vmem:[%s1744_s9] sm:$0xff] }
  0x4d   :  { %1092 = vmatpush3.bf16.msra.mxu0 %v1089_v47  ;;  %v1105_v34 = vpack.c.bf16 %v716_v32, %v715_v31  ;;  %v721_v47 = vld [vmem:[%s1744_s9 + $0x30] sm:$0xff] }
  0x4e   :  { %1084 = vmatpush3.bf16.msra.mxu1 %v1081_v40  ;;  %1094 = vmatprep.subr.bf16.mxu0 %v1093_v49  ;;  %v864_v40 = vld [vmem:[%s1745_s6] ss:$0 sm:$0xff] }
  0x4f   :  { %1086 = vmatprep.subr.bf16.mxu1 %v1085_v43 }
  0x51   :  { %1096 = vmatpush3.bf16.msra.mxu0 %v1093_v49  ;;  %v1117_v49 = vpack.c.bf16 %v722_v48, %v721_v47 }
  0x52   :  { %1088 = vmatpush3.bf16.msra.mxu1 %v1085_v43  ;;  %1098 = vmatprep.subr.bf16.mxu0 %v1097_v52 }
  0x53   :  { %1106 = vmatprep.subr.bf16.mxu1 %v1105_v34 }
  0x55   :  { %1100 = vmatpush3.bf16.msra.mxu0 %v1097_v52 }
  0x56   :  { %1102 = vmatprep.subr.bf16.mxu0 %v1101_v30 }
  0x59   :  { %1104 = vmatpush3.bf16.msra.mxu0 %v1101_v30 }
  0xdf   :  { %v1007_v53 = vpop.f32.mrb[0].mxu0 }
  0xe0   :  { %v334_v54 = vpop.f32.mrb[1].mxu0 }
  0xf8   :  { %v895_v55 = vpop.f32.mrb[0].mxu1 }
  0xf9   :  { %v896_v56 = vpop.f32.mrb[1].mxu1 }
  0xfa   :  { %v897_v57 = vadd.f32 %v896_v56, %v895_v55  ;;  %v898_v58 = vpop.f32.mrb[2].mxu1 }
  0xfb   :  { %v899_v59 = vpop.f32.mrb[3].mxu1 }
  0xfc   :  { %v378_v60 = vadd.f32 %v897_v57, %v334_v54  ;;  %v900_v61 = vadd.f32 %v899_v59, %v898_v58  ;;  %v870_v57 = vld [vmem:[%s1747_s10] ss:$0 sm:$0xff] }
  0xfe   :  { %v381_v62 = vadd.f32 %v1007_v53, %v900_v61 }
  0xff   :  { %v917_v63 = vpop.f32.mrb[4].mxu0 }
 0x100   :  { %v918_v0 = vpop.f32.mrb[5].mxu0 }
 0x101   :  { %v919_v1 = vadd.f32 %v918_v0, %v917_v63  ;;  %v920_v2 = vpop.f32.mrb[6].mxu0 }
 0x102   :  { %v921_v3 = vpop.f32.mrb[7].mxu0 }
 0x103   :  { %v419_v4 = vadd.f32 %v919_v1, %v378_v60  ;;  %v922_v5 = vadd.f32 %v921_v3, %v920_v2 }
 0x105   :  { %v422_v6 = vadd.f32 %v922_v5, %v381_v62 }
 0x118   :  { %v939_v7 = vpop.f32.mrb[4].mxu1 }
 0x119   :  { %v940_v8 = vpop.f32.mrb[5].mxu1 }
 0x11a   :  { %v941_v9 = vadd.f32 %v940_v8, %v939_v7  ;;  %v942_v10 = vpop.f32.mrb[6].mxu1 }
 0x11b   :  { %v943_v11 = vpop.f32.mrb[7].mxu1 }
 0x11c   :  { %v460_v12 = vadd.f32 %v941_v9, %v419_v4  ;;  %v944_v13 = vadd.f32 %v943_v11, %v942_v10 }
 0x11e   :  { %v463_v14 = vadd.f32 %v944_v13, %v422_v6 }
 0x11f   :  { %v961_v15 = vpop.f32.mrb[8].mxu0 }
 0x120   :  { %v962_v16 = vpop.f32.mrb[9].mxu0 }
 0x121   :  { %v963_v17 = vadd.f32 %v962_v16, %v961_v15  ;;  %v964_v18 = vpop.f32.mrb[10].mxu0 }
 0x122   :  { %v965_v20 = vpop.f32.mrb[11].mxu0 }
 0x123   :  { %v501_v21 = vadd.f32 %v963_v17, %v460_v12  ;;  %v966_v22 = vadd.f32 %v965_v20, %v964_v18 }
 0x125   :  { %v514_v23 = vadd.f32 %v863_v19, %v501_v21  ;;  %v504_v24 = vadd.f32 %v966_v22, %v463_v14 }
 0x127   :  { %v516_v25 = vmax.f32 %v514_v23, 0.0  ;;  %v515_v26 = vadd.f32 %v863_v19, %v504_v24 }
 0x129   :  { %v517_v27 = vmax.f32 %v515_v26, 0.0  ;;  %1024 = vmatprep.mubr.msk.f32.mxu1 %vm533_vm1, %v516_v25 }
 0x12b   :  { %1025 = vmatmul.mubr.msk.f32.vlgmr.msra.gmra.mrb[8].mxu1 %vm533_vm1, %v517_v27 }
 0x12c   :  { %1108 = vmatpush3.bf16.msra.mxu1 %v1105_v34 }
 0x12d   :  { %1110 = vmatprep.subr.bf16.mxu1 %v1109_v36 }
 0x130   :  { %1112 = vmatpush3.bf16.msra.mxu1 %v1109_v36 }
 0x131   :  { %1114 = vmatprep.subr.bf16.mxu1 %v1113_v39 }
 0x134   :  { %1116 = vmatpush3.bf16.msra.mxu1 %v1113_v39 }
 0x135   :  { %1118 = vmatprep.subr.bf16.mxu1 %v1117_v49 }
 0x138   :  { %1120 = vmatpush3.bf16.msra.mxu1 %v1117_v49 }
 0x1fe   :  { %v1026_v41 = vpop.f32.mrb[8].mxu1 }
 0x1ff   :  { %v612_v42 = vadd.f32 %v1026_v41, %v864_v40  ;;  %v606_v43 = vpop.f32.mrb[9].mxu1 }
 0x200   :  { %v607_v44 = vadd.f32 %v864_v40, %v606_v43 }
 0x201   :  { %v616_v46 = vmax.f32 %v612_v42, 0.0 }
 0x202   :  { %v615_v45 = vmax.f32 %v607_v44, 0.0 }
 0x204   :  { %1043 = vmatprep.mubr.msk.f32.mxu0 %vm533_vm1, %v615_v45 }
 0x205   :  { %1044 = vmatmul.mubr.msk.f32.vlgmr.msra.gmra.mrb[2].mxu0 %vm533_vm1, %v616_v46 }
 0x2d8   :  { %v1045_v51 = vpop.f32.mrb[2].mxu0 }
 0x2d9   :  { %v710_v52 = vadd.f32 %v1045_v51, %v867_v50  ;;  %v704_v53 = vpop.f32.mrb[3].mxu0 }
 0x2da   :  { %v705_v54 = vadd.f32 %v867_v50, %v704_v53 }
 0x2db   :  { %v714_v56 = vmax.f32 %v710_v52, 0.0 }
 0x2dc   :  { %v713_v55 = vmax.f32 %v705_v54, 0.0 }
 0x2de   :  { %1062 = vmatprep.mubr.msk.f32.mxu1 %vm533_vm1, %v713_v55 }
 0x2df   :  { %1063 = vmatmul.mubr.msk.f32.vlgmr.msra.gmra.mrb[10].mxu1 %vm533_vm1, %v714_v56 }
 0x3b2   :  { %v1064_v58 = vpop.f32.mrb[10].mxu1 }
 0x3b3   :  { %v808_v59 = vadd.f32 %v1064_v58, %v870_v57  ;;  %v802_v60 = vpop.f32.mrb[11].mxu1 }
 0x3b4   :  { %v803_v61 = vadd.f32 %v870_v57, %v802_v60 }
 0x3b5   :  { %v818_v62 = vand.u32 2147483647, %v808_v59  ;;  %v812_v18 = vmax.f32 %v808_v59, 0.0  ;;  %vm814_vm4 = vcmp.ne.f32.partialorder %v808_v59, %v808_v59 }
 0x3b6   :  { %v817_v63 = vand.u32 2147483647, %v803_v61  ;;  %v811_v22 = vmax.f32 %v803_v61, 0.0  ;;  %vm813_vm5 = vcmp.ne.f32.partialorder %v803_v61, %v803_v61 }
 0x3b7   :  { %v820_v0 = vsub.f32 0.0, %v818_v62 }
 0x3b8   :  { %v819_v1 = vsub.f32 0.0, %v817_v63 }
 0x3b9   :  { %v823_v2 = vmul.f32 1.442695, %v820_v0 }
 0x3ba   :  { %v821_v3 = vmul.f32 1.442695, %v819_v1 }
 0x3bb   :  { %1121 = vpow2.f32 %v823_v2 }
 0x3bc   :  { %1123 = vpow2.f32 %v821_v3 }
 0x3c5   :  { %v1122_v4 = vpop.eup %1121 }
 0x3c6   :  { %v1124_v5 = vpop.eup %1123  ;;  %v834_v6 = vadd.f32 1.0, %v1122_v4  ;;  %v837_v8 = vmul.f32 -0.5, %v1122_v4  ;;  %v840_v11 = vand.u32 2147483647, %v1122_v4 }
 0x3c7   :  { %v825_v7 = vadd.f32 1.0, %v1124_v5  ;;  %v828_v9 = vmul.f32 -0.5, %v1124_v5  ;;  %v831_v13 = vand.u32 2147483647, %v1124_v5 }
 0x3c8   :  { %1125 = vlog2.f32 %v834_v6  ;;  %v838_v10 = vadd.f32 1.0, %v837_v8  ;;  %vm841_vm2 = vcmp.lt.f32.partialorder %v840_v11, 0.0004427343 }
 0x3c9   :  { %1127 = vlog2.f32 %v825_v7  ;;  %v829_v12 = vadd.f32 1.0, %v828_v9  ;;  %vm832_vm3 = vcmp.lt.f32.partialorder %v831_v13, 0.0004427343 }
 0x3ca   :  { %v839_v17 = vmul.f32 %v1122_v4, %v838_v10 }
 0x3cb   :  { %v830_v20 = vmul.f32 %v1124_v5, %v829_v12 }
 0x3d2   :  { %v1126_v14 = vpop.eup %1125 }
 0x3d3   :  { %v1128_v15 = vpop.eup %1127  ;;  %v836_v16 = vmul.f32 0.6931472, %v1126_v14 }
 0x3d4   :  { %v827_v19 = vmul.f32 0.6931472, %v1128_v15 }
 0x3d5   :  { %v842_v21 = vsel %vm841_vm2, %v839_v17, %v836_v16 }
 0x3d6   :  { %v844_v23 = vadd.f32 %v842_v21, %v812_v18  ;;  %v833_v24 = vsel %vm832_vm3, %v830_v20, %v827_v19 }
 0x3d7   :  { %v843_v25 = vadd.f32 %v833_v24, %v811_v22 }
 0x3d8   :  { %v846_v26 = vsel %vm814_vm4, %v808_v59, %v844_v23 }
 0x3d9   :  { %v848_v27 = vmul.f32 0.9, %v846_v26  ;;  %v845_v28 = vsel %vm813_vm5, %v803_v61, %v843_v25 }
 0x3da   :  { %v847_v29 = vmul.f32 0.9, %v845_v28 }
 0x3db   :  { %v850_v30 = vadd.f32 0.1, %v848_v27 }
 0x3dc   :  { %v849_v31 = vadd.f32 0.1, %v847_v29 }
 0x3dd   :  { %v853_v32 = vsel %vm851_vm6, %v808_v59, %v850_v30 }
 0x3de   :  { %856 = vst.msk [vmem:[%s1748_s11 + $0x8] sm:$0xff] %vm854_vm7, %v853_v32  ;;  %v852_v33 = vsel %vm851_vm6, %v803_v61, %v849_v31 }
 0x3df   :  { %855 = vst.msk [vmem:[%s1748_s11] sm:$0xff] %vm854_vm7, %v852_v33 }

</bundles_post_ra>
